<compile_context>
chip_gen: v7x
topology: tpu7x:2x2x1
jax: 0.10.0
libtpu: 0.0.40
codegen_flags: <defaults>
</compile_context>

<pallas_src>
import jax
import jax.numpy as jnp
from jax.experimental import pallas as pl
from jax.experimental.pallas import tpu as pltpu


def _round_up(x, m):
    return ((x + m - 1) // m) * m


def threshold_head_kernel(x_ref, batch_ref, feat_ref,
                          w1p_ref, w1f_ref, b1_ref, w2_ref, b2_ref,
                          out_ref, pool_ref):
    i = pl.program_id(0)

    @pl.when(i == 0)
    def _():
        pool_ref[...] = jnp.zeros_like(pool_ref)

    x = x_ref[...]                           # (TILE_N, D) node-feature tile
    batch = batch_ref[...]                   # (1, TILE_N) int32, lane-dense
    num_graphs = pool_ref.shape[0]
    tile_n = x.shape[0]

    # Per-tile one-hot segment matmul on the MXU:
    #   pool[b, d] += sum_{n in tile : batch[n] == b} x[n, d]
    graph_ids = jax.lax.broadcasted_iota(jnp.int32, (num_graphs, tile_n), 0)
    onehot = (graph_ids == batch).astype(jnp.float32)            # (B, TILE_N)
    pool_ref[...] += jnp.dot(onehot, x, preferred_element_type=jnp.float32)

    @pl.when(i == pl.num_programs(0) - 1)
    def _():
        pool = pool_ref[...]                 # (B, D)
        feat = feat_ref[...]                 # (B, 1)  feature_index.unsqueeze(-1)
        # cat([pool, feat], 1) @ W1  ==  pool @ W1[:D]  +  feat ⊗ W1[D]  (outer product on the VPU)
        h = (jnp.dot(pool, w1p_ref[...], preferred_element_type=jnp.float32)
             + feat * w1f_ref[...]
             + b1_ref[...])                  # (B, H)
        h = jnp.where(h > 0, h, 0.01 * h)    # LeakyReLU, torch default slope
        out = jnp.dot(h, w2_ref[...], preferred_element_type=jnp.float32) + b2_ref[...]
        out_ref[...] = out.astype(out_ref.dtype)


def threshold_selection_head(x, batch, feature_index, w1, b1, w2, b2, *, tile_n=512):
    """x: (N, D) f32 node features (post-backbone), batch: (N,) int32 sorted graph ids,
    feature_index: (B,) f32, w1: (D+1, H) (== torch W1.T), b1: (H,), w2: (H, O), b2: (O,)."""
    N, D = x.shape
    B = feature_index.shape[0]
    H = w1.shape[1]
    O = w2.shape[1]

    # Node tile must be a multiple of 128 (lane constraint on the (1, TILE_N) batch block).
    tile_n = max(128, min(_round_up(tile_n, 128), _round_up(N, 128)))
    n_pad = _round_up(N, tile_n)
    o_pad = _round_up(O, 128)                # lane-dense output store

    x_p = jnp.pad(x.astype(jnp.float32), ((0, n_pad - N), (0, 0)))
    # Padded rows get batch id == B, which never matches a real graph -> pool contribution 0.
    batch_p = jnp.pad(batch.astype(jnp.int32), (0, n_pad - N), constant_values=B)
    batch2d = batch_p.reshape(1, n_pad)      # lane-dense in the wrapper (free layout plumbing)
    feat2d = feature_index.reshape(B, 1).astype(jnp.float32)

    w1_pool = w1[:D, :].astype(jnp.float32)                      # (D, H)
    w1_feat = w1[D:D + 1, :].astype(jnp.float32)                 # (1, H)
    b1_2d = b1.reshape(1, H).astype(jnp.float32)
    w2_p = jnp.pad(w2.astype(jnp.float32), ((0, 0), (0, o_pad - O)))
    b2_p = jnp.pad(b2.reshape(1, O).astype(jnp.float32), ((0, 0), (0, o_pad - O)))

    grid = (n_pad // tile_n,)

    cost = pl.CostEstimate(
        flops=2 * B * n_pad * D + 2 * B * (D + 1) * H + 2 * B * H * o_pad,
        transcendentals=0,
        bytes_accessed=(n_pad * D * 4 + n_pad * 4 + B * 4
                        + (D * H + 2 * H + H * o_pad + o_pad) * 4
                        + B * o_pad * 4),
    )

    out_pad = pl.pallas_call(
        threshold_head_kernel,
        out_shape=jax.ShapeDtypeStruct((B, o_pad), jnp.float32),
        grid_spec=pltpu.PrefetchScalarGridSpec(
            num_scalar_prefetch=0,
            grid=grid,
            in_specs=[
                pl.BlockSpec((tile_n, D), lambda i: (i, 0)),     # x: streamed node tiles
                pl.BlockSpec((1, tile_n), lambda i: (0, i)),     # batch: lane-dense tiles
                pl.BlockSpec((B, 1), lambda i: (0, 0)),          # feature_index (resident)
                pl.BlockSpec((D, H), lambda i: (0, 0)),          # W1[:D]
                pl.BlockSpec((1, H), lambda i: (0, 0)),          # W1[D]
                pl.BlockSpec((1, H), lambda i: (0, 0)),          # b1
                pl.BlockSpec((H, o_pad), lambda i: (0, 0)),      # W2 (lane-padded)
                pl.BlockSpec((1, o_pad), lambda i: (0, 0)),      # b2 (lane-padded)
            ],
            out_specs=pl.BlockSpec((B, o_pad), lambda i: (0, 0)),
            scratch_shapes=[pltpu.VMEM((B, D), jnp.float32)],    # pool accumulator
        ),
        compiler_params=pltpu.CompilerParams(
            dimension_semantics=("arbitrary",),                  # node axis is a reduction
            vmem_limit_bytes=32 * 1024 * 1024,                   # explicit; safe on v5e/v6e/v7x
        ),
        cost_estimate=cost,
    )(x_p, batch2d, feat2d, w1_pool, w1_feat, b1_2d, w2_p, b2_p)

    return out_pad[:, :O]


def _reference(x, batch, feature_index, w1, b1, w2, b2, num_graphs):
    pool = jax.ops.segment_sum(x, batch, num_segments=num_graphs)
    xin = jnp.concatenate([pool, feature_index[:, None]], axis=1)
    hp = jax.lax.Precision.HIGHEST
    h = jnp.dot(xin, w1, precision=hp) + b1
    h = jnp.where(h > 0, h, 0.01 * h)
    return jnp.dot(h, w2, precision=hp) + b2


if __name__ == "__main__":
    # Small, module-consistent shapes:
    #   N=200 nodes, D=32 node-feature dim, B=2 graphs,
    #   MLP input_dim = D + 1 = 33, hidden_dim = 64, output_dim = 8.
    N, D, B, H, O = 200, 32, 2, 64, 8

    key = jax.random.PRNGKey(0)
    kx, kf, kw1, kb1, kw2, kb2 = jax.random.split(key, 6)

    x = jax.random.normal(kx, (N, D), dtype=jnp.float32)
    # Deterministic, sorted node->graph assignment (PyG-style contiguous batches).
    batch = jnp.concatenate([jnp.zeros(N // 2, jnp.int32),
                             jnp.ones(N - N // 2, jnp.int32)])
    feature_index = jax.random.normal(kf, (B,), dtype=jnp.float32)

    # Deterministic parameter init (synthetic; shapes match torch Linear layers, stored as W.T).
    w1 = jax.random.normal(kw1, (D + 1, H), dtype=jnp.float32) * 0.1
    b1 = jax.random.normal(kb1, (H,), dtype=jnp.float32) * 0.1
    w2 = jax.random.normal(kw2, (H, O), dtype=jnp.float32) * 0.1
    b2 = jax.random.normal(kb2, (O,), dtype=jnp.float32) * 0.1

    # tile_n=128 -> n_pad=256, grid=(2,): exercises the pooled accumulator + padding path.
    out = threshold_selection_head(x, batch, feature_index, w1, b1, w2, b2, tile_n=128)
    out = jax.block_until_ready(out)

    ref = _reference(x, batch, feature_index, w1, b1, w2, b2, B)
    assert out.shape == (B, O)
    assert jnp.allclose(out, ref, atol=1e-3, rtol=1e-3), float(jnp.max(jnp.abs(out - ref)))
    print("KERNEL_OK")
</pallas_src>

<mosaic_0001>
module attributes {stable_mosaic.version = 11 : i64} {
  func.func @threshold_head_kernel(%arg0: i32, %arg1: memref<128x32xf32, #tpu.memory_space<vmem>>, %arg2: memref<1x128xi32, #tpu.memory_space<vmem>>, %arg3: memref<2x1xf32, #tpu.memory_space<vmem>>, %arg4: memref<32x64xf32, #tpu.memory_space<vmem>>, %arg5: memref<1x64xf32, #tpu.memory_space<vmem>>, %arg6: memref<1x64xf32, #tpu.memory_space<vmem>>, %arg7: memref<64x128xf32, #tpu.memory_space<vmem>>, %arg8: memref<1x128xf32, #tpu.memory_space<vmem>>, %arg9: memref<2x128xf32, #tpu.memory_space<vmem>>, %arg10: memref<2x32xf32, #tpu.memory_space<vmem>>) attributes {dimension_semantics = [#tpu.dimension_semantics<arbitrary>], iteration_bounds = array<i64: 2>, scalar_prefetch = 0 : i64, scratch_operands = 1 : i64, tpu.core_type = #tpu.core_type<tc>, window_params = [{transform_indices = @transform_0, window_bounds = array<i64: 128, 32>}, {transform_indices = @transform_1, window_bounds = array<i64: 1, 128>}, {pipeline_mode = #tpu.pipeline_mode<synchronous>, transform_indices = @transform_2, window_bounds = array<i64: 2, 1>}, {pipeline_mode = #tpu.pipeline_mode<synchronous>, transform_indices = @transform_3, window_bounds = array<i64: 32, 64>}, {pipeline_mode = #tpu.pipeline_mode<synchronous>, transform_indices = @transform_4, window_bounds = array<i64: 1, 64>}, {pipeline_mode = #tpu.pipeline_mode<synchronous>, transform_indices = @transform_5, window_bounds = array<i64: 1, 64>}, {pipeline_mode = #tpu.pipeline_mode<synchronous>, transform_indices = @transform_6, window_bounds = array<i64: 64, 128>}, {pipeline_mode = #tpu.pipeline_mode<synchronous>, transform_indices = @transform_7, window_bounds = array<i64: 1, 128>}, {pipeline_mode = #tpu.pipeline_mode<synchronous>, transform_indices = @transform_8, window_bounds = array<i64: 2, 128>}]} {
    %c0_i32 = arith.constant 0 : i32
    %0 = arith.cmpi eq, %arg0, %c0_i32 : i32
    %1 = arith.extui %0 : i1 to i32
    %c0_i32_0 = arith.constant 0 : i32
    %2 = arith.cmpi ne, %1, %c0_i32_0 : i32
    scf.if %2 {
      %cst_9 = arith.constant 0.000000e+00 : f32
      %17 = vector.broadcast %cst_9 : f32 to vector<2x32xf32>
      %c0_10 = arith.constant 0 : index
      %c0_11 = arith.constant 0 : index
      %18 = vector.load %arg10[%c0_10, %c0_11] : memref<2x32xf32, #tpu.memory_space<vmem>>, vector<2x32xf32>
      tpu.vector_store %arg10[%c0_10, %c0_11], %17 {strides = array<i32>} : memref<2x32xf32, #tpu.memory_space<vmem>>, vector<2x32xf32>,
    } else {
    }
    %c0 = arith.constant 0 : index
    %c0_1 = arith.constant 0 : index
    %3 = vector.load %arg1[%c0, %c0_1] : memref<128x32xf32, #tpu.memory_space<vmem>>, vector<128x32xf32>
    %c0_2 = arith.constant 0 : index
    %c0_3 = arith.constant 0 : index
    %4 = vector.load %arg2[%c0_2, %c0_3] : memref<1x128xi32, #tpu.memory_space<vmem>>, vector<1x128xi32>
    %5 = tpu.iota {dimensions = array<i32: 0>} : vector<2x128xi32>
    %6 = vector.broadcast %4 : vector<1x128xi32> to vector<2x128xi32>
    %7 = arith.cmpi eq, %5, %6 : vector<2x128xi32>
    %8 = arith.extui %7 : vector<2x128xi1> to vector<2x128xi32>
    %9 = arith.sitofp %8 : vector<2x128xi32> to vector<2x128xf32>
    %c0_4 = arith.constant 0 : index
    %c0_5 = arith.constant 0 : index
    %10 = vector.load %arg10[%c0_4, %c0_5] : memref<2x32xf32, #tpu.memory_space<vmem>>, vector<2x32xf32>
    %cst = arith.constant dense<0.000000e+00> : vector<2x32xf32>
    %11 = tpu.matmul %9, %3, %cst {dimension_numbers = #tpu.dot_dimension_numbers<[1], [0], [0], [1], [0, 0, 1, 1], [], []>} : vector<2x128xf32>, vector<128x32xf32>, vector<2x32xf32> -> vector<2x32xf32>
    %12 = arith.addf %10, %11 : vector<2x32xf32>
    %c0_6 = arith.constant 0 : index
    %c0_7 = arith.constant 0 : index
    %13 = vector.load %arg10[%c0_6, %c0_7] : memref<2x32xf32, #tpu.memory_space<vmem>>, vector<2x32xf32>
    tpu.vector_store %arg10[%c0_6, %c0_7], %12 {strides = array<i32>} : memref<2x32xf32, #tpu.memory_space<vmem>>, vector<2x32xf32>,
    %c1_i32 = arith.constant 1 : i32
    %14 = arith.cmpi eq, %arg0, %c1_i32 : i32
    %15 = arith.extui %14 : i1 to i32
    %c0_i32_8 = arith.constant 0 : i32
    %16 = arith.cmpi ne, %15, %c0_i32_8 : i32
    scf.if %16 {
      %c0_9 = arith.constant 0 : index
      %c0_10 = arith.constant 0 : index
      %17 = vector.load %arg10[%c0_9, %c0_10] : memref<2x32xf32, #tpu.memory_space<vmem>>, vector<2x32xf32>
      %c0_11 = arith.constant 0 : index
      %c0_12 = arith.constant 0 : index
      %18 = vector.load %arg3[%c0_11, %c0_12] : memref<2x1xf32, #tpu.memory_space<vmem>>, vector<2x1xf32>
      %c0_13 = arith.constant 0 : index
      %c0_14 = arith.constant 0 : index
      %19 = vector.load %arg4[%c0_13, %c0_14] : memref<32x64xf32, #tpu.memory_space<vmem>>, vector<32x64xf32>
      %cst_15 = arith.constant dense<0.000000e+00> : vector<2x64xf32>
      %20 = tpu.matmul %17, %19, %cst_15 {dimension_numbers = #tpu.dot_dimension_numbers<[1], [0], [0], [1], [0, 0, 1, 1], [], []>} : vector<2x32xf32>, vector<32x64xf32>, vector<2x64xf32> -> vector<2x64xf32>
      %c0_16 = arith.constant 0 : index
      %c0_17 = arith.constant 0 : index
      %21 = vector.load %arg5[%c0_16, %c0_17] : memref<1x64xf32, #tpu.memory_space<vmem>>, vector<1x64xf32>
      %22 = vector.broadcast %18 : vector<2x1xf32> to vector<2x64xf32>
      %23 = vector.broadcast %21 : vector<1x64xf32> to vector<2x64xf32>
      %24 = arith.mulf %22, %23 : vector<2x64xf32>
      %25 = arith.addf %20, %24 : vector<2x64xf32>
      %c0_18 = arith.constant 0 : index
      %c0_19 = arith.constant 0 : index
      %26 = vector.load %arg6[%c0_18, %c0_19] : memref<1x64xf32, #tpu.memory_space<vmem>>, vector<1x64xf32>
      %27 = vector.broadcast %26 : vector<1x64xf32> to vector<2x64xf32>
      %28 = arith.addf %25, %27 : vector<2x64xf32>
      %cst_20 = arith.constant 0.000000e+00 : f32
      %29 = vector.broadcast %cst_20 : f32 to vector<2x64xf32>
      %30 = arith.cmpf ogt, %28, %29 : vector<2x64xf32>
      %cst_21 = arith.constant 0.00999999977 : f32
      %31 = vector.broadcast %cst_21 : f32 to vector<2x64xf32>
      %32 = arith.mulf %31, %28 : vector<2x64xf32>
      %33 = arith.select %30, %28, %32 : vector<2x64xi1>, vector<2x64xf32>
      %c0_22 = arith.constant 0 : index
      %c0_23 = arith.constant 0 : index
      %34 = vector.load %arg7[%c0_22, %c0_23] : memref<64x128xf32, #tpu.memory_space<vmem>>, vector<64x128xf32>
      %cst_24 = arith.constant dense<0.000000e+00> : vector<2x128xf32>
      %35 = tpu.matmul %33, %34, %cst_24 {dimension_numbers = #tpu.dot_dimension_numbers<[1], [0], [0], [1], [0, 0, 1, 1], [], []>} : vector<2x64xf32>, vector<64x128xf32>, vector<2x128xf32> -> vector<2x128xf32>
      %c0_25 = arith.constant 0 : index
      %c0_26 = arith.constant 0 : index
      %36 = vector.load %arg8[%c0_25, %c0_26] : memref<1x128xf32, #tpu.memory_space<vmem>>, vector<1x128xf32>
      %37 = vector.broadcast %36 : vector<1x128xf32> to vector<2x128xf32>
      %38 = arith.addf %35, %37 : vector<2x128xf32>
      %c0_27 = arith.constant 0 : index
      %c0_28 = arith.constant 0 : index
      %39 = vector.load %arg9[%c0_27, %c0_28] : memref<2x128xf32, #tpu.memory_space<vmem>>, vector<2x128xf32>
      tpu.vector_store %arg9[%c0_27, %c0_28], %38 {strides = array<i32>} : memref<2x128xf32, #tpu.memory_space<vmem>>, vector<2x128xf32>,
    } else {
    }
    return
  }
  func.func @transform_0(%arg0: i32) -> (i32, i32) {
    %c0_i32 = arith.constant 0 : i32
    %c0_i32_0 = arith.constant 0 : i32
    return %arg0, %c0_i32 : i32, i32
  }
  func.func @transform_1(%arg0: i32) -> (i32, i32) {
    %c0_i32 = arith.constant 0 : i32
    %c0_i32_0 = arith.constant 0 : i32
    return %c0_i32, %arg0 : i32, i32
  }
  func.func @transform_2(%arg0: i32) -> (i32, i32) {
    %c0_i32 = arith.constant 0 : i32
    %c0_i32_0 = arith.constant 0 : i32
    %c0_i32_1 = arith.constant 0 : i32
    return %c0_i32, %c0_i32_0 : i32, i32
  }
  func.func @transform_3(%arg0: i32) -> (i32, i32) {
    %c0_i32 = arith.constant 0 : i32
    %c0_i32_0 = arith.constant 0 : i32
    %c0_i32_1 = arith.constant 0 : i32
    return %c0_i32, %c0_i32_0 : i32, i32
  }
  func.func @transform_4(%arg0: i32) -> (i32, i32) {
    %c0_i32 = arith.constant 0 : i32
    %c0_i32_0 = arith.constant 0 : i32
    %c0_i32_1 = arith.constant 0 : i32
    return %c0_i32, %c0_i32_0 : i32, i32
  }
  func.func @transform_5(%arg0: i32) -> (i32, i32) {
    %c0_i32 = arith.constant 0 : i32
    %c0_i32_0 = arith.constant 0 : i32
    %c0_i32_1 = arith.constant 0 : i32
    return %c0_i32, %c0_i32_0 : i32, i32
  }
  func.func @transform_6(%arg0: i32) -> (i32, i32) {
    %c0_i32 = arith.constant 0 : i32
    %c0_i32_0 = arith.constant 0 : i32
    %c0_i32_1 = arith.constant 0 : i32
    return %c0_i32, %c0_i32_0 : i32, i32
  }
  func.func @transform_7(%arg0: i32) -> (i32, i32) {
    %c0_i32 = arith.constant 0 : i32
    %c0_i32_0 = arith.constant 0 : i32
    %c0_i32_1 = arith.constant 0 : i32
    return %c0_i32, %c0_i32_0 : i32, i32
  }
  func.func @transform_8(%arg0: i32) -> (i32, i32) {
    %c0_i32 = arith.constant 0 : i32
    %c0_i32_0 = arith.constant 0 : i32
    %c0_i32_1 = arith.constant 0 : i32
    return %c0_i32, %c0_i32_0 : i32, i32
  }
}

</mosaic_0001>

<bundles_post_ra>
// kernel: tpu_custom_call.1
= control target key start
LH: loop header
LB: loop body
LE: loop exit
PB: predicated region body
PF: predicated region fallthrough
CT: control target
= control target key end

     0   :  { %13 = vsyncpa [#allocation4], 0  ;;  %s943_s27 = smov 0   ;;  %s1066_s0 = inlined_call_operand.vmem [shape: f32[256,32], index: 0, kind: input, shape index: {}]   ;;  %s1067_s1 = inlined_call_operand.vmem [shape: s32[1,256], index: 1, kind: input, shape index: {}]   ;;  %s1068_s2 = inlined_call_operand.vmem [shape: f32[2,1], index: 2, kind: input, shape index: {}]   ;;  %s1069_s3 = inlined_call_operand.vmem [shape: f32[32,64], index: 3, kind: input, shape index: {}]   ;;  %s1070_s4 = inlined_call_operand.vmem [shape: f32[1,64], index: 4, kind: input, shape index: {}]   ;;  %s1071_s5 = inlined_call_operand.vmem [shape: f32[1,64], index: 5, kind: input, shape index: {}]   ;;  %s1072_s6 = inlined_call_operand.vmem [shape: f32[64,128], index: 6, kind: input, shape index: {}]   ;;  %s1073_s7 = inlined_call_operand.vmem [shape: f32[1,128], index: 7, kind: input, shape index: {}]   ;;  %s1074_s8 = inlined_call_operand.hbm [shape: f32[2,128], index: 8, kind: output, shape index: {}]  }
   0x1 LB: > { %s949_s28 = sadd.s32 4294967295, %s886_s27   ;;  %p670_p0 = scmp.ge.s32.totalorder %s886_s27, 1  ;;  %s886_s27 = sphi %s943_s27, %s19_s27  }
   0x2   : > { %p267_p1 = scmp.lt.s32.totalorder %s886_s27, 3 }
   0x4   : > { %p268_p2 = pnand %p670_p0, %p267_p1 }
   0x5   : > { %s671_s29 = sshll.u32 (!%p268_p2), %s949_s28, 4  ;;  %p305_p3 = scmp.lt.s32.totalorder (!%p268_p2), %s949_s28, 1 }
   0x6   : > { %271 = sbr.rel (%p268_p2) target bundleno = 736 (0x2e0), region = 52  ;;  %p300_p4 = scmp.lt.s32.totalorder (!%p268_p2), %s671_s29, 31 }
   0x7   : > { %p673_p5 = scmp.ne.s32.totalorder (!%p268_p2), %s949_s28, 0 }
   0xd   : > { %s956_s30 = scalar_select %p305_p3, %s949_s28, 1 }
   0xe   : > { %s1076_s29 = smov (!%p300_p4, %s671_s29), 31  ;;  %311 = sbr.rel (%p673_p5) target bundleno = 21 (0x15), region = 56 }
   0xf   : > { %s307_s11 = scalar_lea.vmem %s1067_s1, %s956_s30  ;;  %s672_s12 = sshll.u32 %s1076_s29, 3  ;;  %vm312_vm0 = vcmask (!%p673_p5), 254976   ;;  %v888_v0 = vmov (!%p673_p5), 0.0  }
  0x10   : > { %s965_s15 = scalar_lea.vmem %s1066_s0, %s672_s12  ;;  %313 = vst.msk [vmem:[#allocation2] sm:$0x3] (!%p673_p5), %vm312_vm0, %v888_v0 }
  0x15 PF: > { %v314_v1 = vld [vmem:[%s965_s15] sm:$0xff]  ;;  %v315_v2 = vld [vmem:[%s965_s15 + $0x8] sm:$0xff]  ;;  %v316_v3 = vld [vmem:[%s965_s15 + $0x10] sm:$0xff]  ;;  %v889_v4 = vmov 0.0|0.0   ;;  %vm890_vm1 = vmmov 0   ;;  %v891_v7 = vmov 0.0   ;;  %v331_v24 = vlaneseq }
  0x16   : > { %783 = vmatprep.subr.bf16.mxu0 %v889_v4  ;;  %v784_v5 = vpack.c.bf16 %v315_v2, %v314_v1  ;;  %v317_v6 = vld [vmem:[%s965_s15 + $0x18] sm:$0xff]  ;;  %750 = vmatprep.mubr.msk.f32.mxu0 %vm890_vm1, %v891_v7  ;;  %v318_v9 = vld [vmem:[%s965_s15 + $0x20] sm:$0xff]  ;;  %v319_v10 = vld [vmem:[%s965_s15 + $0x28] sm:$0xff]  ;;  %v892_v30 = vmov 1.0   ;;  %vm412_vm3 = vcmask 254976   ;;  %p677_p6 = scmp.ne.s32.totalorder %s949_s28, 1 }
  0x17   : > { %v787_v8 = vpack.c.bf16 %v317_v6, %v316_v3  ;;  %v790_v11 = vpack.c.bf16 %v319_v10, %v318_v9  ;;  %v320_v12 = vld [vmem:[%s965_s15 + $0x30] sm:$0xff]  ;;  %v321_v13 = vld [vmem:[%s965_s15 + $0x38] sm:$0xff]  ;;  %v322_v15 = vld [vmem:[%s965_s15 + $0x40] sm:$0xff]  ;;  %v332_v28 = vshrl.u32 %v331_v24, 7  ;;  %v893_v38 = vmov (!%p677_p6), 0.0|0.0  }
  0x18   : > { %785 = vmatpush3.bf16.msra.mxu0 %v784_v5  ;;  %v793_v14 = vpack.c.bf16 %v321_v13, %v320_v12  ;;  %v323_v16 = vld [vmem:[%s965_s15 + $0x48] sm:$0xff]  ;;  %v324_v18 = vld [vmem:[%s965_s15 + $0x50] sm:$0xff]  ;;  %v325_v19 = vld [vmem:[%s965_s15 + $0x58] sm:$0xff]  ;;  %vm894_vm4 = vmmov (!%p677_p6), 0   ;;  %v895_v41 = vmov (!%p677_p6), 0.0   ;;  %v896_v43 = vmov (!%p677_p6), 0   ;;  %813 = vmatprep.subr.bf16.mxu1 (!%p677_p6), %v893_v38 }
  0x19   : > { %786 = vmatprep.subr.bf16.mxu0 %v889_v4  ;;  %v796_v17 = vpack.c.bf16 %v323_v16, %v322_v15  ;;  %v799_v20 = vpack.c.bf16 %v325_v19, %v324_v18  ;;  %v326_v21 = vld [vmem:[%s965_s15 + $0x60] sm:$0xff]  ;;  %v327_v22 = vld [vmem:[%s965_s15 + $0x68] sm:$0xff]  ;;  %v328_v25 = vld [vmem:[%s965_s15 + $0x70] sm:$0xff]  ;;  %849 = vset.pattern.permute.xlu0 (!%p677_p6), %v896_v43  ;;  %vm437_vm5 = vcmask (!%p677_p6), 261120   ;;  %vm537_vm7 = vcmask (!%p677_p6), 523264  }
  0x1a   : > { %v802_v23 = vpack.c.bf16 %v327_v22, %v326_v21  ;;  %v329_v26 = vld [vmem:[%s965_s15 + $0x78] sm:$0xff]  ;;  %v674_v29 = vld [vmem:[%s307_s11] ss:$0 sm:$0xff]  ;;  %v421_v36 = vld [vmem:[%s1069_s3 + $0x8] sm:$0xff] (!%p677_p6)  ;;  %780 = vmatprep.mubr.msk.f32.mxu1 (!%p677_p6), %vm894_vm4, %v895_v41 }
  0x1b   : > { %v805_v27 = vpack.c.bf16 %v329_v26, %v328_v25  ;;  %vm337_vm2 = vcmp.eq.s32.totalorder %v332_v28, %v674_v29  ;;  %v340_v31 = vld [vmem:[#allocation2] sm:$0x3]  ;;  %v422_v37 = vld [vmem:[%s1069_s3 + $0x10] sm:$0xff] (!%p677_p6)  ;;  %v423_v40 = vld [vmem:[%s1069_s3 + $0x18] sm:$0xff] (!%p677_p6) }
  0x1c   : > { %788 = vmatpush3.bf16.msra.mxu0 %v787_v8  ;;  %v420_v35 = vld [vmem:[%s1069_s3] sm:$0xff] (!%p677_p6)  ;;  %v523_v45 = vld [vmem:[%s1072_s6 + $0x8] sm:$0xff] (!%p677_p6)  ;;  %v524_v46 = vld [vmem:[%s1072_s6 + $0x10] sm:$0xff] (!%p677_p6)  ;;  %v811_v47 = vpack.c.bf16 (!%p677_p6), %v423_v40, %v422_v37 }
  0x1d   : > { %789 = vmatprep.subr.bf16.mxu0 %v889_v4  ;;  %v808_v39 = vpack.c.bf16 (!%p677_p6), %v421_v36, %v420_v35  ;;  %v522_v42 = vld [vmem:[%s1072_s6] sm:$0xff] (!%p677_p6)  ;;  %v525_v49 = vld [vmem:[%s1072_s6 + $0x18] sm:$0xff] (!%p677_p6)  ;;  %v527_v53 = vld [vmem:[%s1072_s6 + $0x28] sm:$0xff] (!%p677_p6) }
  0x1e   : > { %v419_v44 = vld [vmem:[%s1068_s2] sm:$0x3] (!%p677_p6)  ;;  %v814_v48 = vpack.c.bf16 (!%p677_p6), %v523_v45, %v522_v42  ;;  %v817_v50 = vpack.c.bf16 (!%p677_p6), %v525_v49, %v524_v46  ;;  %v528_v55 = vld [vmem:[%s1072_s6 + $0x30] sm:$0xff] (!%p677_p6)  ;;  %v529_v56 = vld [vmem:[%s1072_s6 + $0x38] sm:$0xff] (!%p677_p6) }
  0x1f   : > { %427 = vperm.xlu0 (!%p677_p6), %849, %v419_v44   ;;  %v526_v52 = vld [vmem:[%s1072_s6 + $0x20] sm:$0xff] (!%p677_p6)  ;;  %v823_v57 = vpack.c.bf16 (!%p677_p6), %v529_v56, %v528_v55 }
  0x20   : > { %791 = vmatpush3.bf16.msra.mxu0 %v790_v11  ;;  %815 = vmatpush3.bf16.msra.mxu1 (!%p677_p6), %v814_v48  ;;  %v820_v54 = vpack.c.bf16 (!%p677_p6), %v527_v53, %v526_v52  ;;  %v678_v58 = vld [vmem:[%s1070_s4] ss:$0 sm:$0xff] (!%p677_p6) }
  0x21   : > { %792 = vmatprep.subr.bf16.mxu0 %v889_v4  ;;  %816 = vmatprep.subr.bf16.mxu1 (!%p677_p6), %v893_v38  ;;  %v680_v62 = vld [vmem:[%s1071_s5] ss:$0 sm:$0xff] (!%p677_p6) }
  0x24   : > { %794 = vmatpush3.bf16.msra.mxu0 %v793_v14  ;;  %818 = vmatpush3.bf16.msra.mxu1 (!%p677_p6), %v817_v50 }
  0x25   : > { %795 = vmatprep.subr.bf16.mxu0 %v889_v4  ;;  %819 = vmatprep.subr.bf16.mxu1 (!%p677_p6), %v893_v38 }
  0x28   : > { %797 = vmatpush3.bf16.msra.mxu0 %v796_v17  ;;  %821 = vmatpush3.bf16.msra.mxu1 (!%p677_p6), %v820_v54 }
  0x29   : > { %798 = vmatprep.subr.bf16.mxu0 %v889_v4  ;;  %822 = vmatprep.subr.bf16.mxu1 (!%p677_p6), %v893_v38 }
  0x2c   : > { %800 = vmatpush3.bf16.msra.mxu0 %v799_v20  ;;  %824 = vmatpush3.bf16.msra.mxu1 (!%p677_p6), %v823_v57 }
  0x2d   : > { %801 = vmatprep.subr.bf16.mxu0 %v889_v4 }
  0x30   : > { %803 = vmatpush3.bf16.msra.mxu0 %v802_v23 }
  0x31   : > { %804 = vmatprep.subr.bf16.mxu0 %v889_v4  ;;  %v681_v4 = vld [vmem:[%s1073_s7] ss:$0 sm:$0xff] (!%p677_p6) }
  0x34   : > { %806 = vmatpush3.bf16.msra.mxu0 %v805_v27 }
  0x35   : > { %807 = vmatprep.subr.bf16.mxu0 (!%p677_p6), %v893_v38 }
  0x37   : > { %751 = vmatmul.mubr.msk.f32.vlgmr.msra.gmra.mrb[0].mxu0 %vm337_vm2, %v892_v30 }
  0x38   : > { %761 = vmatprep.mubr.msk.f32.mxu0 (!%p677_p6), %vm894_vm4, %v895_v41  ;;  %809 = vmatpush3.bf16.msra.mxu0 (!%p677_p6), %v808_v39 }
  0x39   : > { %810 = vmatprep.subr.bf16.mxu0 (!%p677_p6), %v893_v38 }
  0x3c   : > { %812 = vmatpush3.bf16.msra.mxu0 (!%p677_p6), %v811_v47 }
  0x9e   : > { %v428_v59 = vpop.permute.xlu0 (!%p677_p6), %427 }
  0x9f   : > { %v436_v60 = vmul.f32 (!%p677_p6), %v678_v58, %v428_v59 }
 0x107   : > { %417 = sbr.rel (%p677_p6) target bundleno = 711 (0x2c7), region = 60 }
 0x10a   : > { %v407_v32 = vpop.f32.mrb[0].mxu0 }
 0x10b   : > { %v411_v33 = vadd.f32 %v407_v32, %v340_v31  ;;  %v752_v34 = vpop.f32.mrb[1].mxu0 }
 0x10d   : > { %413 = vst.msk [vmem:[#allocation2] sm:$0x3] %vm412_vm3, %v411_v33 }
 0x114   : > { %v418_v51 = vld [vmem:[#allocation2] sm:$0x3] }
 0x115   : > { %762 = vmatmul.mubr.msk.f32.vlgmr.msra.gmra.mrb[0].mxu0 %vm437_vm5, %v418_v51 }
 0x1e8   : > { %v507_v61 = vpop.f32.mrb[0].mxu0 }
 0x1e9   : > { %v508_v63 = vadd.f32 %v507_v61, %v436_v60  ;;  %v763_v0 = vpop.f32.mrb[1].mxu0 }
 0x1eb   : > { %v518_v1 = vadd.f32 %v680_v62, %v508_v63 }
 0x1ed   : > { %v520_v2 = vmul.f32 0.01, %v518_v1  ;;  %vm519_vm6 = vcmp.gt.f32.partialorder %v518_v1, 0.0 }
 0x1ef   : > { %v521_v3 = vsel %vm519_vm6, %v518_v1, %v520_v2 }
 0x1f0   : > { %781 = vmatmul.mubr.msk.f32.vlgmr.msra.gmra.mrb[0].mxu1 %vm537_vm7, %v521_v3 }
 0x2c3   : > { %v607_v5 = vpop.f32.mrb[0].mxu1 }
 0x2c4   : > { %v608_v6 = vadd.f32 %v681_v4, %v607_v5  ;;  %v782_v7 = vpop.f32.mrb[1].mxu1 }
 0x2c6   : > { %611 = vst [vmem:[#allocation3] sm:$0x3] %v608_v6 }
 0x2c7 PF: > { %p829_p7 = scmp.eq.s32.totalorder %s949_s28, 1  ;;  %s897_s10 = smov [#allocation3]  }
 0x2c8   : > { %s619_s11 = sshll.u32 %s897_s10, 4  ;;  %s620_s11 = int_to_ptr.vmem [resolvable:$true] %s619_s11 }
 0x2c9   : > { %s850_s12 = scalar_lea.vmem %s620_s11, 32  ;;  %p857_p11 = scmp.lt.s32.totalorder %s620_s11, %s620_s11 }
 0x2ca   : > { %p851_p8 = scmp.ne.s32.totalorder %s620_s11, %s850_s12  ;;  %p858_p12 = scmp.lt.s32.totalorder %s850_s12, %s850_s12 }
 0x2cc   : > { %p852_p9 = pnand %p851_p8, %p829_p7  ;;  %p859_p13 = por %p858_p12, %p857_p11 }
 0x2ce   : > { %p853_p10 = pneg %p852_p9 }
 0x2d0   : > { %p860_p0 = pnand %p859_p13, %p853_p10 }
 0x2d2   : > { %863 = shalt.err (!%p860_p0)
}
 0x2d3   : > { %s864_s15 = scalar_lea.hbm %s1074_s8, 32 }
 0x2d4   : > { %p865_p1 = scmp.ne.s32.totalorder %s1074_s8, %s864_s15  ;;  %p870_p4 = scmp.lt.u32.totalorder %s864_s15, %s1074_s8 }
 0x2d6   : > { %p866_p2 = pnand %p865_p1, %p829_p7 }
 0x2d8   : > { %p867_p3 = pneg %p866_p2 }
 0x2da   : > { %p872_p5 = pnand %p870_p4, %p867_p3 }
 0x2dc   : > { %875 = shalt.err (!%p872_p5)
}
 0x2dd   : > { %826 = dma.vmem_to_hbm [thread:$0]  (%p829_p7), %s620_s11, 32, %s1074_s8, [#allocation4]  }
 0x2de   : > { %881 = dma.done.wait (%p829_p7), [#allocation4], 32  }
 0x2df   : > { %883 = vsyncadd (%p829_p7), [#allocation4], 4294967264 }
 0x2e0 PF: > { %s19_s27 = sadd.s32 1, %s886_s27  }
 0x2e1   : > { %p16_p6 = scmp.ge.s32.totalorder %s19_s27, 4  }
 0x2e3   :  { %18 = sbr.rel (!%p16_p6) target bundleno = 1 (0x1), region = 90 }
 0x2ea   :  { %632 = vsyncpa [#allocation4], 1 }
 0x2eb   :  { %634 = vsyncpa [#allocation4 + $0x1], 1 }

</bundles_post_ra>
